<compile_context>
chip_gen: v7x
topology: tpu7x:2x2x1
jax: 0.10.0
libtpu: 0.0.40
codegen_flags: <defaults>
</compile_context>

<pallas_src>
import math
import numpy as np
import jax
import jax.numpy as jnp
from jax.experimental import pallas as pl
from jax.experimental.pallas import tpu as pltpu


# ----------------------------- Pallas kernel ------------------------------

def ghost_bottleneck_kernel(x_ref, s_ref, w1_ref, b1_ref, a1_ref, bd1_ref,
                            w2_ref, b2_ref, a2f_ref, bo_ref, o_ref):
    f32 = jnp.float32
    x = x_ref[...]                # (M, W*Cin), lane-dense (W*Cin == 128 here)
    sm = s_ref[0]                 # (M, M) picks row h-1 (zero row at h == 0)
    sp = s_ref[1]                 # (M, M) picks row h+1 (zero row at h == H-1)

    # ---- ghost1 primary: 1x1 conv (block-diagonal weight) + folded BN + ReLU
    y1 = jnp.dot(x, w1_ref[...], preferred_element_type=f32) + b1_ref[...]
    y1 = jnp.maximum(y1, 0.0)

    # ---- ghost1 cheap op: depthwise 3x3 as shift-matrix matmuls + ReLU
    y1m = jnp.dot(sm, y1, preferred_element_type=f32)
    y1p = jnp.dot(sp, y1, preferred_element_type=f32)
    y2 = (jnp.dot(y1m, a1_ref[0], preferred_element_type=f32)
          + jnp.dot(y1,  a1_ref[1], preferred_element_type=f32)
          + jnp.dot(y1p, a1_ref[2], preferred_element_type=f32)
          + bd1_ref[...])
    y2 = jnp.maximum(y2, 0.0)

    # ---- ghost2 primary: K-split matmuls (replaces concat + slice), no act
    z1 = (jnp.dot(y1, w2_ref[0], preferred_element_type=f32)
          + jnp.dot(y2, w2_ref[1], preferred_element_type=f32)
          + b2_ref[...])

    # ---- ghost2 cheap op + channel placement (concat) + identity residual,
    #      all folded into the (pre-fused) tap matrices -> lane-dense output
    z1m = jnp.dot(sm, z1, preferred_element_type=f32)
    z1p = jnp.dot(sp, z1, preferred_element_type=f32)
    out = (jnp.dot(z1m, a2f_ref[0], preferred_element_type=f32)
           + jnp.dot(z1,  a2f_ref[1], preferred_element_type=f32)
           + jnp.dot(z1p, a2f_ref[2], preferred_element_type=f32)
           + bo_ref[...]
           + x)
    o_ref[...] = out.astype(o_ref.dtype)


# ---------------------- fused-operand construction ------------------------

def _fold_bn(w, bn, eps=1e-5):
    gamma, beta, mean, var = bn
    s = gamma / jnp.sqrt(var + eps)          # per output channel
    return np.asarray(w * s, np.float32), np.asarray(beta - mean * s, np.float32)


def _block_diag(w, W):
    """kron(I_W, w): 1x1 conv on the fused (W*C) lane axis."""
    return np.kron(np.eye(W, dtype=np.float32), np.asarray(w, np.float32))


def _tile_bias(b, W):
    return np.tile(np.asarray(b, np.float32), W).reshape(1, -1)


def _tap_matrices(wd, W):
    """A[dy]: (W*C, W*C).  (y_rowshift_dy @ A[dy]) applies the three dx taps of
    a depthwise 3x3 (per-channel weights) with W-border zero padding built in."""
    C = wd.shape[-1]
    A = np.zeros((3, W * C, W * C), np.float32)
    for dy in range(3):
        for dx in range(3):
            for w in range(W):
                ws = w + dx - 1
                if 0 <= ws < W:
                    A[dy, ws * C:(ws + 1) * C, w * C:(w + 1) * C] = np.diag(wd[dy, dx])
    return A


def _row_shift_matrices(block_n, H):
    """S[0] @ y -> row h-1 (zero at h==0); S[1] @ y -> row h+1 (zero at h==H-1).
    Image boundaries inside the batch block are zeroed as well."""
    m = block_n * H
    s = np.zeros((2, m, m), np.float32)
    for r in range(m):
        h = r % H
        if h > 0:
            s[0, r, r - 1] = 1.0
        if h < H - 1:
            s[1, r, r + 1] = 1.0
    return s


def _placement_matrices(c2, out_chs, W):
    """0/1 matrices placing z1 channels at out[:c2] and z2 channels at
    out[c2:out_chs] of every pixel block (the ghost2 concat + slice)."""
    e = np.zeros((2, W * c2, W * out_chs), np.float32)
    for w in range(W):
        for j in range(c2):
            e[0, w * c2 + j, w * out_chs + j] = 1.0
        for j in range(min(c2, out_chs - c2)):
            e[1, w * c2 + j, w * out_chs + c2 + j] = 1.0
    return e


# ------------------------------ wrapper ------------------------------------

def ghost_bottleneck_pallas(x_nhwc, raw, *, block_n=2):
    """x_nhwc: (N, H, W, Cin) float32. raw: parameter dict from init_params."""
    N, H, W, Cin = x_nhwc.shape
    mid, out_chs = raw['mid'], raw['out']
    assert Cin == out_chs, "identity-residual config requires in_chs == out_chs"
    assert N % block_n == 0, "batch must be divisible by the per-step block"
    # TODO(synk): stride>1 / SE / conv-shortcut variants are not implemented.

    c1 = math.ceil(mid / 2)
    c2 = math.ceil(out_chs / 2)

    # Fold eval-mode BatchNorm into the conv weights/biases.
    w1, b1 = _fold_bn(raw['w1'], raw['bn1'])
    wd1, bd1 = _fold_bn(raw['wd1'], raw['bnd1'])
    w2, b2 = _fold_bn(raw['w2'], raw['bn2'])
    wd2, bd2 = _fold_bn(raw['wd2'], raw['bnd2'])

    # Fused-lane operands.
    w1_bd = _block_diag(w1, W)                                    # (W*Cin, W*c1)
    w2a = w2[:c1]
    w2b = np.zeros((c1, c2), np.float32)
    w2b[:mid - c1] = w2[c1:mid]                                   # mid-slice baked in
    w2_stk = np.stack([_block_diag(w2a, W), _block_diag(w2b, W)]) # (2, W*c1, W*c2)
    a1 = _tap_matrices(wd1, W)                                    # (3, W*c1, W*c1)
    a2 = _tap_matrices(wd2, W)                                    # (3, W*c2, W*c2)
    s = _row_shift_matrices(block_n, H)                           # (2, M, M)
    e = _placement_matrices(c2, out_chs, W)                       # (2, W*c2, W*out)
    b1_t, bd1_t = _tile_bias(b1, W), _tile_bias(bd1, W)
    b2_t, bd2_t = _tile_bias(b2, W), _tile_bias(bd2, W)

    # Fold the ghost2 concat/placement (linear: ghost2 has no activation) into
    # the ghost2 tap matrices and depthwise bias -> 2 fewer matmuls per block
    # and lane-dense (W*out) tap outputs feeding the residual/store directly.
    a2f = np.stack([a2[0] @ e[1],                                 # (3, W*c2, W*out)
                    e[0] + a2[1] @ e[1],
                    a2[2] @ e[1]])
    bo_t = bd2_t @ e[1]                                           # (1, W*out)

    # 2-D fused layout: rows = N*H (sublanes), lanes = W*C.
    x_f = x_nhwc.astype(jnp.float32).reshape(N * H, W * Cin)

    m = block_n * H
    l0, l1, l2, lo = W * Cin, W * c1, W * c2, W * out_chs
    steps = N // block_n
    flops = steps * (2 * m * l0 * l1              # ghost1 primary
                     + 2 * (2 * m * m * l1)       # ghost1 row shifts
                     + 3 * (2 * m * l1 * l1)      # ghost1 taps
                     + 2 * (2 * m * l1 * l2)      # ghost2 primary (K-split)
                     + 2 * (2 * m * m * l2)       # ghost2 row shifts
                     + 3 * (2 * m * l2 * lo))     # ghost2 taps (placement fused)
    weight_bytes = 4 * (w1_bd.size + w2_stk.size + a1.size + a2f.size + s.size
                        + b1_t.size + bd1_t.size + b2_t.size + bo_t.size)
    bytes_accessed = 8 * x_f.size + weight_bytes     # input + output + weights

    consts = [jnp.asarray(v) for v in
              (s, w1_bd, b1_t, a1, bd1_t, w2_stk, b2_t, a2f, bo_t)]
    const_specs = [pl.BlockSpec(c.shape, (lambda n, _r=c.ndim: (0,) * _r))
                   for c in consts]

    out_f = pl.pallas_call(
        ghost_bottleneck_kernel,
        out_shape=jax.ShapeDtypeStruct((N * H, W * out_chs), jnp.float32),
        grid_spec=pltpu.PrefetchScalarGridSpec(
            num_scalar_prefetch=0,
            grid=(steps,),                            # block_n images per step
            in_specs=[pl.BlockSpec((m, W * Cin), lambda n: (n, 0))] + const_specs,
            out_specs=pl.BlockSpec((m, W * out_chs), lambda n: (n, 0)),
        ),
        compiler_params=pltpu.CompilerParams(
            dimension_semantics=("parallel",),        # v7x: shard batch over 2 TCs
            vmem_limit_bytes=32 * 1024 * 1024),
        cost_estimate=pl.CostEstimate(flops=int(flops), transcendentals=0,
                                      bytes_accessed=int(bytes_accessed)),
    )(x_f, *consts)

    return out_f.reshape(N, H, W, out_chs)


# ---------------------- parameter init (deterministic) ---------------------

def init_params(key, in_chs, mid_chs, out_chs):
    c1 = math.ceil(mid_chs / 2)           # ghost1 init_channels
    c2 = math.ceil(out_chs / 2)           # ghost2 init_channels
    ks = jax.random.split(key, 4)
    w1 = jax.random.normal(ks[0], (in_chs, c1), jnp.float32) / math.sqrt(in_chs)
    wd1 = jax.random.normal(ks[1], (3, 3, c1), jnp.float32) / 3.0
    w2 = jax.random.normal(ks[2], (mid_chs, c2), jnp.float32) / math.sqrt(mid_chs)
    wd2 = jax.random.normal(ks[3], (3, 3, c2), jnp.float32) / 3.0

    def bn_params(c, base):
        gamma = 1.0 + 0.05 * jnp.arange(c, dtype=jnp.float32)
        beta = 0.02 * jnp.arange(c, dtype=jnp.float32) - base
        mean = 0.01 * jnp.arange(c, dtype=jnp.float32)
        var = 1.0 + 0.03 * jnp.arange(c, dtype=jnp.float32)
        return gamma, beta, mean, var

    return dict(w1=w1, bn1=bn_params(c1, 0.01),
                wd1=wd1, bnd1=bn_params(c1, 0.02),
                w2=w2, bn2=bn_params(c2, 0.03),
                wd2=wd2, bnd2=bn_params(c2, 0.04),
                mid=mid_chs, out=out_chs)


# ----------------------------- JAX reference ------------------------------

def _bn(x, gamma, beta, mean, var, eps=1e-5):
    return (x - mean) / jnp.sqrt(var + eps) * gamma + beta


def _conv1x1(x, w):
    return jnp.einsum('nhwc,cd->nhwd', x, w)


def _dwconv3x3_ref(x, w):
    C = x.shape[-1]
    return jax.lax.conv_general_dilated(
        x, w.reshape(3, 3, 1, C), window_strides=(1, 1), padding='SAME',
        dimension_numbers=('NHWC', 'HWIO', 'NHWC'), feature_group_count=C)


def _ghost_module_ref(x, wp, bnp, wd, bnd, oup, act):
    x1 = _bn(_conv1x1(x, wp), *bnp)
    if act:
        x1 = jax.nn.relu(x1)
    x2 = _bn(_dwconv3x3_ref(x1, wd), *bnd)
    if act:
        x2 = jax.nn.relu(x2)
    return jnp.concatenate([x1, x2], axis=-1)[..., :oup]


def ghost_bottleneck_ref(x, raw):
    g1 = _ghost_module_ref(x, raw['w1'], raw['bn1'], raw['wd1'], raw['bnd1'],
                           raw['mid'], act=True)
    g2 = _ghost_module_ref(g1, raw['w2'], raw['bn2'], raw['wd2'], raw['bnd2'],
                           raw['out'], act=False)
    return g2 + x


# --------------------------------- main ------------------------------------

if __name__ == "__main__":
    N, in_chs, mid_chs, out_chs, H, W = 4, 8, 16, 8, 16, 16
    key = jax.random.PRNGKey(0)
    kx, kp = jax.random.split(key)

    # PyTorch-style NCHW input, transposed to NHWC so channels land on lanes.
    x_nchw = jax.random.normal(kx, (N, in_chs, H, W), jnp.float32)
    x = jnp.transpose(x_nchw, (0, 2, 3, 1))

    raw = init_params(kp, in_chs, mid_chs, out_chs)

    out = ghost_bottleneck_pallas(x, raw, block_n=2)
    out = jax.block_until_ready(out)

    ref = ghost_bottleneck_ref(x, raw)
    assert out.shape == (N, H, W, out_chs)
    err = float(jnp.max(jnp.abs(out - ref)))
    assert jnp.allclose(out, ref, rtol=1e-3, atol=1e-3), f"max abs err {err}"
    print("KERNEL_OK")
</pallas_src>

<mosaic_0001>
module attributes {stable_mosaic.version = 11 : i64} {
  func.func @ghost_bottleneck_kernel(%arg0: i32, %arg1: memref<32x128xf32, #tpu.memory_space<vmem>>, %arg2: memref<2x32x32xf32, #tpu.memory_space<vmem>>, %arg3: memref<128x128xf32, #tpu.memory_space<vmem>>, %arg4: memref<1x128xf32, #tpu.memory_space<vmem>>, %arg5: memref<3x128x128xf32, #tpu.memory_space<vmem>>, %arg6: memref<1x128xf32, #tpu.memory_space<vmem>>, %arg7: memref<2x128x64xf32, #tpu.memory_space<vmem>>, %arg8: memref<1x64xf32, #tpu.memory_space<vmem>>, %arg9: memref<3x64x128xf32, #tpu.memory_space<vmem>>, %arg10: memref<1x128xf32, #tpu.memory_space<vmem>>, %arg11: memref<32x128xf32, #tpu.memory_space<vmem>>) attributes {dimension_semantics = [#tpu.dimension_semantics<parallel>], iteration_bounds = array<i64: 2>, scalar_prefetch = 0 : i64, scratch_operands = 0 : i64, tpu.core_type = #tpu.core_type<tc>, window_params = [{transform_indices = @transform_0, window_bounds = array<i64: 32, 128>}, {pipeline_mode = #tpu.pipeline_mode<synchronous>, transform_indices = @transform_1, window_bounds = array<i64: 2, 32, 32>}, {pipeline_mode = #tpu.pipeline_mode<synchronous>, transform_indices = @transform_2, window_bounds = array<i64: 128, 128>}, {pipeline_mode = #tpu.pipeline_mode<synchronous>, transform_indices = @transform_3, window_bounds = array<i64: 1, 128>}, {pipeline_mode = #tpu.pipeline_mode<synchronous>, transform_indices = @transform_4, window_bounds = array<i64: 3, 128, 128>}, {pipeline_mode = #tpu.pipeline_mode<synchronous>, transform_indices = @transform_5, window_bounds = array<i64: 1, 128>}, {pipeline_mode = #tpu.pipeline_mode<synchronous>, transform_indices = @transform_6, window_bounds = array<i64: 2, 128, 64>}, {pipeline_mode = #tpu.pipeline_mode<synchronous>, transform_indices = @transform_7, window_bounds = array<i64: 1, 64>}, {pipeline_mode = #tpu.pipeline_mode<synchronous>, transform_indices = @transform_8, window_bounds = array<i64: 3, 64, 128>}, {pipeline_mode = #tpu.pipeline_mode<synchronous>, transform_indices = @transform_9, window_bounds = array<i64: 1, 128>}, {transform_indices = @transform_10, window_bounds = array<i64: 32, 128>}]} {
    %c0 = arith.constant 0 : index
    %c0_0 = arith.constant 0 : index
    %0 = vector.load %arg1[%c0, %c0_0] : memref<32x128xf32, #tpu.memory_space<vmem>>, vector<32x128xf32>
    %c0_1 = arith.constant 0 : index
    %c0_2 = arith.constant 0 : index
    %c0_3 = arith.constant 0 : index
    %1 = vector.load %arg2[%c0_1, %c0_2, %c0_3] : memref<2x32x32xf32, #tpu.memory_space<vmem>>, vector<1x32x32xf32>
    %2 = vector.shape_cast %1 : vector<1x32x32xf32> to vector<32x32xf32>
    %c1 = arith.constant 1 : index
    %c0_4 = arith.constant 0 : index
    %c0_5 = arith.constant 0 : index
    %3 = vector.load %arg2[%c1, %c0_4, %c0_5] : memref<2x32x32xf32, #tpu.memory_space<vmem>>, vector<1x32x32xf32>
    %4 = vector.shape_cast %3 : vector<1x32x32xf32> to vector<32x32xf32>
    %c0_6 = arith.constant 0 : index
    %c0_7 = arith.constant 0 : index
    %5 = vector.load %arg3[%c0_6, %c0_7] : memref<128x128xf32, #tpu.memory_space<vmem>>, vector<128x128xf32>
    %cst = arith.constant dense<0.000000e+00> : vector<32x128xf32>
    %6 = tpu.matmul %0, %5, %cst {dimension_numbers = #tpu.dot_dimension_numbers<[1], [0], [0], [1], [0, 0, 1, 1], [], []>} : vector<32x128xf32>, vector<128x128xf32>, vector<32x128xf32> -> vector<32x128xf32>
    %c0_8 = arith.constant 0 : index
    %c0_9 = arith.constant 0 : index
    %7 = vector.load %arg4[%c0_8, %c0_9] : memref<1x128xf32, #tpu.memory_space<vmem>>, vector<1x128xf32>
    %8 = vector.broadcast %7 : vector<1x128xf32> to vector<32x128xf32>
    %9 = arith.addf %6, %8 : vector<32x128xf32>
    %cst_10 = arith.constant 0.000000e+00 : f32
    %10 = vector.broadcast %cst_10 : f32 to vector<32x128xf32>
    %11 = arith.maximumf %9, %10 : vector<32x128xf32>
    %cst_11 = arith.constant dense<0.000000e+00> : vector<32x128xf32>
    %12 = tpu.matmul %2, %11, %cst_11 {dimension_numbers = #tpu.dot_dimension_numbers<[1], [0], [0], [1], [0, 0, 1, 1], [], []>} : vector<32x32xf32>, vector<32x128xf32>, vector<32x128xf32> -> vector<32x128xf32>
    %cst_12 = arith.constant dense<0.000000e+00> : vector<32x128xf32>
    %13 = tpu.matmul %4, %11, %cst_12 {dimension_numbers = #tpu.dot_dimension_numbers<[1], [0], [0], [1], [0, 0, 1, 1], [], []>} : vector<32x32xf32>, vector<32x128xf32>, vector<32x128xf32> -> vector<32x128xf32>
    %c0_13 = arith.constant 0 : index
    %c0_14 = arith.constant 0 : index
    %c0_15 = arith.constant 0 : index
    %14 = vector.load %arg5[%c0_13, %c0_14, %c0_15] : memref<3x128x128xf32, #tpu.memory_space<vmem>>, vector<1x128x128xf32>
    %15 = vector.shape_cast %14 : vector<1x128x128xf32> to vector<128x128xf32>
    %cst_16 = arith.constant dense<0.000000e+00> : vector<32x128xf32>
    %16 = tpu.matmul %12, %15, %cst_16 {dimension_numbers = #tpu.dot_dimension_numbers<[1], [0], [0], [1], [0, 0, 1, 1], [], []>} : vector<32x128xf32>, vector<128x128xf32>, vector<32x128xf32> -> vector<32x128xf32>
    %c1_17 = arith.constant 1 : index
    %c0_18 = arith.constant 0 : index
    %c0_19 = arith.constant 0 : index
    %17 = vector.load %arg5[%c1_17, %c0_18, %c0_19] : memref<3x128x128xf32, #tpu.memory_space<vmem>>, vector<1x128x128xf32>
    %18 = vector.shape_cast %17 : vector<1x128x128xf32> to vector<128x128xf32>
    %cst_20 = arith.constant dense<0.000000e+00> : vector<32x128xf32>
    %19 = tpu.matmul %11, %18, %cst_20 {dimension_numbers = #tpu.dot_dimension_numbers<[1], [0], [0], [1], [0, 0, 1, 1], [], []>} : vector<32x128xf32>, vector<128x128xf32>, vector<32x128xf32> -> vector<32x128xf32>
    %20 = arith.addf %16, %19 : vector<32x128xf32>
    %c2 = arith.constant 2 : index
    %c0_21 = arith.constant 0 : index
    %c0_22 = arith.constant 0 : index
    %21 = vector.load %arg5[%c2, %c0_21, %c0_22] : memref<3x128x128xf32, #tpu.memory_space<vmem>>, vector<1x128x128xf32>
    %22 = vector.shape_cast %21 : vector<1x128x128xf32> to vector<128x128xf32>
    %cst_23 = arith.constant dense<0.000000e+00> : vector<32x128xf32>
    %23 = tpu.matmul %13, %22, %cst_23 {dimension_numbers = #tpu.dot_dimension_numbers<[1], [0], [0], [1], [0, 0, 1, 1], [], []>} : vector<32x128xf32>, vector<128x128xf32>, vector<32x128xf32> -> vector<32x128xf32>
    %24 = arith.addf %20, %23 : vector<32x128xf32>
    %c0_24 = arith.constant 0 : index
    %c0_25 = arith.constant 0 : index
    %25 = vector.load %arg6[%c0_24, %c0_25] : memref<1x128xf32, #tpu.memory_space<vmem>>, vector<1x128xf32>
    %26 = vector.broadcast %25 : vector<1x128xf32> to vector<32x128xf32>
    %27 = arith.addf %24, %26 : vector<32x128xf32>
    %cst_26 = arith.constant 0.000000e+00 : f32
    %28 = vector.broadcast %cst_26 : f32 to vector<32x128xf32>
    %29 = arith.maximumf %27, %28 : vector<32x128xf32>
    %c0_27 = arith.constant 0 : index
    %c0_28 = arith.constant 0 : index
    %c0_29 = arith.constant 0 : index
    %30 = vector.load %arg7[%c0_27, %c0_28, %c0_29] : memref<2x128x64xf32, #tpu.memory_space<vmem>>, vector<1x128x64xf32>
    %31 = vector.shape_cast %30 : vector<1x128x64xf32> to vector<128x64xf32>
    %cst_30 = arith.constant dense<0.000000e+00> : vector<32x64xf32>
    %32 = tpu.matmul %11, %31, %cst_30 {dimension_numbers = #tpu.dot_dimension_numbers<[1], [0], [0], [1], [0, 0, 1, 1], [], []>} : vector<32x128xf32>, vector<128x64xf32>, vector<32x64xf32> -> vector<32x64xf32>
    %c1_31 = arith.constant 1 : index
    %c0_32 = arith.constant 0 : index
    %c0_33 = arith.constant 0 : index
    %33 = vector.load %arg7[%c1_31, %c0_32, %c0_33] : memref<2x128x64xf32, #tpu.memory_space<vmem>>, vector<1x128x64xf32>
    %34 = vector.shape_cast %33 : vector<1x128x64xf32> to vector<128x64xf32>
    %cst_34 = arith.constant dense<0.000000e+00> : vector<32x64xf32>
    %35 = tpu.matmul %29, %34, %cst_34 {dimension_numbers = #tpu.dot_dimension_numbers<[1], [0], [0], [1], [0, 0, 1, 1], [], []>} : vector<32x128xf32>, vector<128x64xf32>, vector<32x64xf32> -> vector<32x64xf32>
    %36 = arith.addf %32, %35 : vector<32x64xf32>
    %c0_35 = arith.constant 0 : index
    %c0_36 = arith.constant 0 : index
    %37 = vector.load %arg8[%c0_35, %c0_36] : memref<1x64xf32, #tpu.memory_space<vmem>>, vector<1x64xf32>
    %38 = vector.broadcast %37 : vector<1x64xf32> to vector<32x64xf32>
    %39 = arith.addf %36, %38 : vector<32x64xf32>
    %cst_37 = arith.constant dense<0.000000e+00> : vector<32x64xf32>
    %40 = tpu.matmul %2, %39, %cst_37 {dimension_numbers = #tpu.dot_dimension_numbers<[1], [0], [0], [1], [0, 0, 1, 1], [], []>} : vector<32x32xf32>, vector<32x64xf32>, vector<32x64xf32> -> vector<32x64xf32>
    %cst_38 = arith.constant dense<0.000000e+00> : vector<32x64xf32>
    %41 = tpu.matmul %4, %39, %cst_38 {dimension_numbers = #tpu.dot_dimension_numbers<[1], [0], [0], [1], [0, 0, 1, 1], [], []>} : vector<32x32xf32>, vector<32x64xf32>, vector<32x64xf32> -> vector<32x64xf32>
    %c0_39 = arith.constant 0 : index
    %c0_40 = arith.constant 0 : index
    %c0_41 = arith.constant 0 : index
    %42 = vector.load %arg9[%c0_39, %c0_40, %c0_41] : memref<3x64x128xf32, #tpu.memory_space<vmem>>, vector<1x64x128xf32>
    %43 = vector.shape_cast %42 : vector<1x64x128xf32> to vector<64x128xf32>
    %cst_42 = arith.constant dense<0.000000e+00> : vector<32x128xf32>
    %44 = tpu.matmul %40, %43, %cst_42 {dimension_numbers = #tpu.dot_dimension_numbers<[1], [0], [0], [1], [0, 0, 1, 1], [], []>} : vector<32x64xf32>, vector<64x128xf32>, vector<32x128xf32> -> vector<32x128xf32>
    %c1_43 = arith.constant 1 : index
    %c0_44 = arith.constant 0 : index
    %c0_45 = arith.constant 0 : index
    %45 = vector.load %arg9[%c1_43, %c0_44, %c0_45] : memref<3x64x128xf32, #tpu.memory_space<vmem>>, vector<1x64x128xf32>
    %46 = vector.shape_cast %45 : vector<1x64x128xf32> to vector<64x128xf32>
    %cst_46 = arith.constant dense<0.000000e+00> : vector<32x128xf32>
    %47 = tpu.matmul %39, %46, %cst_46 {dimension_numbers = #tpu.dot_dimension_numbers<[1], [0], [0], [1], [0, 0, 1, 1], [], []>} : vector<32x64xf32>, vector<64x128xf32>, vector<32x128xf32> -> vector<32x128xf32>
    %48 = arith.addf %44, %47 : vector<32x128xf32>
    %c2_47 = arith.constant 2 : index
    %c0_48 = arith.constant 0 : index
    %c0_49 = arith.constant 0 : index
    %49 = vector.load %arg9[%c2_47, %c0_48, %c0_49] : memref<3x64x128xf32, #tpu.memory_space<vmem>>, vector<1x64x128xf32>
    %50 = vector.shape_cast %49 : vector<1x64x128xf32> to vector<64x128xf32>
    %cst_50 = arith.constant dense<0.000000e+00> : vector<32x128xf32>
    %51 = tpu.matmul %41, %50, %cst_50 {dimension_numbers = #tpu.dot_dimension_numbers<[1], [0], [0], [1], [0, 0, 1, 1], [], []>} : vector<32x64xf32>, vector<64x128xf32>, vector<32x128xf32> -> vector<32x128xf32>
    %52 = arith.addf %48, %51 : vector<32x128xf32>
    %c0_51 = arith.constant 0 : index
    %c0_52 = arith.constant 0 : index
    %53 = vector.load %arg10[%c0_51, %c0_52] : memref<1x128xf32, #tpu.memory_space<vmem>>, vector<1x128xf32>
    %54 = vector.broadcast %53 : vector<1x128xf32> to vector<32x128xf32>
    %55 = arith.addf %52, %54 : vector<32x128xf32>
    %56 = arith.addf %55, %0 : vector<32x128xf32>
    %c0_53 = arith.constant 0 : index
    %c0_54 = arith.constant 0 : index
    %57 = vector.load %arg11[%c0_53, %c0_54] : memref<32x128xf32, #tpu.memory_space<vmem>>, vector<32x128xf32>
    tpu.vector_store %arg11[%c0_53, %c0_54], %56 {strides = array<i32>} : memref<32x128xf32, #tpu.memory_space<vmem>>, vector<32x128xf32>,
    return
  }
  func.func @transform_0(%arg0: i32) -> (i32, i32) {
    %c0_i32 = arith.constant 0 : i32
    %c0_i32_0 = arith.constant 0 : i32
    return %arg0, %c0_i32 : i32, i32
  }
  func.func @transform_1(%arg0: i32) -> (i32, i32, i32) {
    %c0_i32 = arith.constant 0 : i32
    %c0_i32_0 = arith.constant 0 : i32
    %c0_i32_1 = arith.constant 0 : i32
    %c0_i32_2 = arith.constant 0 : i32
    return %c0_i32, %c0_i32_0, %c0_i32_1 : i32, i32, i32
  }
  func.func @transform_2(%arg0: i32) -> (i32, i32) {
    %c0_i32 = arith.constant 0 : i32
    %c0_i32_0 = arith.constant 0 : i32
    %c0_i32_1 = arith.constant 0 : i32
    return %c0_i32, %c0_i32_0 : i32, i32
  }
  func.func @transform_3(%arg0: i32) -> (i32, i32) {
    %c0_i32 = arith.constant 0 : i32
    %c0_i32_0 = arith.constant 0 : i32
    %c0_i32_1 = arith.constant 0 : i32
    return %c0_i32, %c0_i32_0 : i32, i32
  }
  func.func @transform_4(%arg0: i32) -> (i32, i32, i32) {
    %c0_i32 = arith.constant 0 : i32
    %c0_i32_0 = arith.constant 0 : i32
    %c0_i32_1 = arith.constant 0 : i32
    %c0_i32_2 = arith.constant 0 : i32
    return %c0_i32, %c0_i32_0, %c0_i32_1 : i32, i32, i32
  }
  func.func @transform_5(%arg0: i32) -> (i32, i32) {
    %c0_i32 = arith.constant 0 : i32
    %c0_i32_0 = arith.constant 0 : i32
    %c0_i32_1 = arith.constant 0 : i32
    return %c0_i32, %c0_i32_0 : i32, i32
  }
  func.func @transform_6(%arg0: i32) -> (i32, i32, i32) {
    %c0_i32 = arith.constant 0 : i32
    %c0_i32_0 = arith.constant 0 : i32
    %c0_i32_1 = arith.constant 0 : i32
    %c0_i32_2 = arith.constant 0 : i32
    return %c0_i32, %c0_i32_0, %c0_i32_1 : i32, i32, i32
  }
  func.func @transform_7(%arg0: i32) -> (i32, i32) {
    %c0_i32 = arith.constant 0 : i32
    %c0_i32_0 = arith.constant 0 : i32
    %c0_i32_1 = arith.constant 0 : i32
    return %c0_i32, %c0_i32_0 : i32, i32
  }
  func.func @transform_8(%arg0: i32) -> (i32, i32, i32) {
    %c0_i32 = arith.constant 0 : i32
    %c0_i32_0 = arith.constant 0 : i32
    %c0_i32_1 = arith.constant 0 : i32
    %c0_i32_2 = arith.constant 0 : i32
    return %c0_i32, %c0_i32_0, %c0_i32_1 : i32, i32, i32
  }
  func.func @transform_9(%arg0: i32) -> (i32, i32) {
    %c0_i32 = arith.constant 0 : i32
    %c0_i32_0 = arith.constant 0 : i32
    %c0_i32_1 = arith.constant 0 : i32
    return %c0_i32, %c0_i32_0 : i32, i32
  }
  func.func @transform_10(%arg0: i32) -> (i32, i32) {
    %c0_i32 = arith.constant 0 : i32
    %c0_i32_0 = arith.constant 0 : i32
    return %arg0, %c0_i32 : i32, i32
  }
}

</mosaic_0001>

<bundles_post_ra>
// kernel: tpu_custom_call.1
= control target key start
LH: loop header
LB: loop body
LE: loop exit
PB: predicated region body
PF: predicated region fallthrough
CT: control target
= control target key end

     0   :  { %s3805_s0 = inlined_call_operand.hbm [shape: f32[64,128], index: 0, kind: input, shape index: {}]   ;;  %s3806_s1 = inlined_call_operand.hbm [shape: f32[2,32,32], index: 1, kind: input, shape index: {}]   ;;  %s3807_s2 = inlined_call_operand.hbm [shape: f32[128,128], index: 2, kind: input, shape index: {}]   ;;  %s3808_s3 = inlined_call_operand.vmem [shape: f32[1,128], index: 3, kind: input, shape index: {}]   ;;  %s3809_s4 = inlined_call_operand.vmem [shape: f32[3,128,128], index: 4, kind: input, shape index: {}]   ;;  %s3810_s5 = inlined_call_operand.vmem [shape: f32[1,128], index: 5, kind: input, shape index: {}]   ;;  %s3811_s6 = inlined_call_operand.vmem [shape: f32[2,128,64], index: 6, kind: input, shape index: {}]   ;;  %s3812_s7 = inlined_call_operand.vmem [shape: f32[1,64], index: 7, kind: input, shape index: {}]   ;;  %s3813_s8 = inlined_call_operand.hbm [shape: f32[3,64,128], index: 8, kind: input, shape index: {}]   ;;  %s3814_s9 = inlined_call_operand.vmem [shape: f32[1,128], index: 9, kind: input, shape index: {}]   ;;  %s3815_s10 = inlined_call_operand.hbm [shape: f32[64,128], index: 10, kind: output, shape index: {}]  }
   0x1   :  { %3822 = sst [smem:[#allocation17_spill]] %s3814_s9 }
   0x2   :  { %3823 = sst [smem:[#allocation18_spill]] %s3815_s10 }
   0x3   :  { %15 = vsyncpa [#allocation3], 0 }
   0x4   :  { %17 = vsyncpa [#allocation3 + $0x1], 0 }
   0x5   :  { %18 = vsyncpa [#allocation6], 0 }
   0x6   :  { %19 = vsyncpa [#allocation9], 0 }
   0x7   :  { %20 = vsyncpa [#allocation4], 0 }
   0x8   :  { %22 = vsyncpa [#allocation4 + $0x1], 0  ;;  %s3176_s13 = smov 0   ;;  %s3178_s14 = smov 0  }
   0x9   :  { %s3180_s15 = smov 0   ;;  %s3182_s16 = smov 0  }
   0xa LB: > { %3824 = sst [smem:[#allocation15_spill]] %s3098_s13  ;;  %s3197_s17 = sadd.s32 4294967295, %s3110_s16   ;;  %s3110_s16 = sphi %s3182_s16, %s3850_s16   ;;  %s3106_s15 = sphi %s3180_s15, %s3849_s15   ;;  %s3102_s14 = sphi %s3178_s14, %s3848_s14   ;;  %s3098_s13 = sphi %s3176_s13, %s3847_s13  }
   0xb   : > { %s1909_s18 = sadd.s32 4294967294, %s3110_s16   ;;  %p48_p0 = scmp.ne.s32.totalorder %s3102_s14, %s3098_s13 }
   0xc   : > { %p3816_p1 = scmp.eq.s32.totalorder %s3197_s17, 0  ;;  %p267_p3 = scmp.eq.s32.totalorder %s1909_s18, 1 }
   0xd   : > { %p1910_p5 = scmp.ge.s32.totalorder %s3110_s16, 1  ;;  %p274_p7 = scmp.lt.s32.totalorder %s3110_s16, 3 }
   0xe   : > { %p3206_p4 = por %p3816_p1, %p48_p0  ;;  %p3211_p6 = por %p267_p3, %p48_p0 }
   0xf   : > { %p3216_p8 = pnand %p1910_p5, %p274_p7  ;;  %s3112_s22 = smov [#allocation5]  }
  0x10   : > { %s3825_s19 = scalar_select %p3206_p4, 1, 0 }
  0x11   : > { %s3826_s20 = scalar_select %p3211_p6, 1, 0 }
  0x12   : > { %s3828_s21 = scalar_select %p3216_p8, 1, 0 }
  0x13   : > { %3827 = sst [smem:[#allocation16_spill]] %s3826_s20  ;;  %s286_s23 = sshll.u32 %s3112_s22, 4  ;;  %s3220_s23 = int_to_ptr.vmem [resolvable:$true] %s286_s23 }
  0x14   : > { %p2857_p9 = pneg %p3216_p8  ;;  %s3113_s25 = smov [#allocation7]  }
  0x15   : > { %s299_s26 = sshll.u32 %s3113_s25, 4  ;;  %s3114_s27 = smov [#allocation8]   ;;  %s3231_s26 = int_to_ptr.vmem [resolvable:$true] %s299_s26 }
  0x16   : > { %p3227_p11 = pnand %p2857_p9, %p3816_p1  ;;  %s3233_s28 = sshll.u32 %s3114_s27, 4  ;;  %s328_s28 = int_to_ptr.vmem [resolvable:$true] %s3233_s28 }
  0x17   : > { %s2922_s11 = scalar_lea.hbm %s3806_s1, 1024 }
  0x18   : > { %p2923_p12 = scmp.ne.s32.totalorder %s3806_s1, %s2922_s11  ;;  %p3243_p13 = pneg %p3227_p11 }
  0x19   : > { %p2929_p5 = scmp.lt.u32.totalorder %s2922_s11, %s3806_s1 }
  0x1a   : > { %p2925_p0 = pnand %p3243_p13, %p2923_p12 }
  0x1c   : > { %p2926_p3 = pneg %p2925_p0 }
  0x1e   : > { %p2931_p7 = pnand %p2929_p5, %p2926_p3 }
  0x20   : > { %2934 = shalt.err (!%p2931_p7)
}
  0x21   : > { %s2935_s29 = scalar_lea.vmem %s3220_s23, 1024  ;;  %p2943_p2 = scmp.lt.s32.totalorder %s3220_s23, %s3220_s23 }
  0x22   : > { %p2936_p9 = scmp.ne.s32.totalorder %s3220_s23, %s2935_s29  ;;  %p2944_p6 = scmp.lt.s32.totalorder %s2935_s29, %s2935_s29 }
  0x24   : > { %p2938_p10 = pnand %p2936_p9, %p3243_p13  ;;  %p2945_p12 = por %p2944_p6, %p2943_p2 }
  0x26   : > { %p2939_p1 = pneg %p2938_p10 }
  0x28   : > { %p2946_p0 = pnand %p2945_p12, %p2939_p1 }
  0x2a   : > { %2949 = shalt.err (!%p2946_p0)
}
  0x2b   : > { %s3115_s30 = smov 128   ;;  %s3116_s11 = smov 8  }
  0x2c   : > { %2860 = dma.hbm_to_vmem [thread:$0]  (!%p3227_p11), %s3806_s1, 1024, %s3220_s23, [#allocation6], %s3115_s30, %s3115_s30, %s3116_s11  }
  0x2d   : > { %s2950_s29 = scalar_lea.hbm %s3807_s2, 2048 }
  0x2e   : > { %p2951_p1 = scmp.ne.s32.totalorder %s3807_s2, %s2950_s29  ;;  %p2957_p10 = scmp.lt.u32.totalorder %s2950_s29, %s3807_s2 }
  0x30   : > { %p2953_p2 = pnand %p2951_p1, %p3243_p13 }
  0x32   : > { %p2954_p6 = pneg %p2953_p2 }
  0x34   : > { %p2959_p3 = pnand %p2957_p10, %p2954_p6 }
  0x36   : > { %2962 = shalt.err (!%p2959_p3)
}
  0x37   : > { %s2963_s23 = scalar_lea.vmem %s3231_s26, 2048  ;;  %p2971_p12 = scmp.lt.s32.totalorder %s3231_s26, %s3231_s26 }
  0x38   : > { %p2964_p5 = scmp.ne.s32.totalorder %s3231_s26, %s2963_s23  ;;  %p2972_p0 = scmp.lt.s32.totalorder %s2963_s23, %s2963_s23 }
  0x3a   : > { %p2966_p7 = pnand %p2964_p5, %p3243_p13  ;;  %p2973_p1 = por %p2972_p0, %p2971_p12 }
  0x3c   : > { %p2967_p9 = pneg %p2966_p7 }
  0x3e   : > { %p2974_p2 = pnand %p2973_p1, %p2967_p9 }
  0x40   : > { %2977 = shalt.err (!%p2974_p2)
}
  0x41   : > { %2863 = dma.hbm_to_vmem [thread:$0]  (!%p3227_p11), %s3807_s2, 2048, %s3231_s26, [#allocation6], %s3115_s30, %s3115_s30, %s3116_s11  }
  0x42   : > { %s2978_s12 = scalar_lea.hbm %s3813_s8, 3072 }
  0x43   : > { %p2979_p6 = scmp.ne.s32.totalorder %s3813_s8, %s2978_s12  ;;  %p2985_p5 = scmp.lt.u32.totalorder %s2978_s12, %s3813_s8 }
  0x45   : > { %p2981_p10 = pnand %p2979_p6, %p3243_p13 }
  0x47   : > { %p2982_p3 = pneg %p2981_p10 }
  0x49   : > { %p2987_p7 = pnand %p2985_p5, %p2982_p3 }
  0x4b   : > { %2990 = shalt.err (!%p2987_p7)
}
  0x4c   : > { %s2991_s23 = scalar_lea.vmem %s328_s28, 3072  ;;  %p2999_p1 = scmp.lt.s32.totalorder %s328_s28, %s328_s28 }
  0x4d   : > { %p2992_p9 = scmp.ne.s32.totalorder %s328_s28, %s2991_s23  ;;  %p3000_p2 = scmp.lt.s32.totalorder %s2991_s23, %s2991_s23 }
  0x4f   : > { %p2994_p12 = pnand %p2992_p9, %p3243_p13  ;;  %p3001_p4 = por %p3000_p2, %p2999_p1 }
  0x51   : > { %p2995_p0 = pneg %p2994_p12 }
  0x53   : > { %p3002_p8 = pnand %p3001_p4, %p2995_p0 }
  0x55   : > { %3005 = shalt.err (!%p3002_p8)
}
  0x56   : > { %2866 = dma.hbm_to_vmem [thread:$0]  (!%p3227_p11), %s3813_s8, 3072, %s328_s28, [#allocation9], %s3115_s30, %s3115_s30, %s3116_s11  }
  0x57   : > { %s3316_s22 = sadd.s32 1, %s3110_s16   ;;  %s35_s10 = sadd.s32 1, %s3106_s15 }
  0x58   : > { %s32_s24 = ssub.s32 %s3110_s16, %s3316_s22  ;;  %p42_p8 = scmp.ne.s32.totalorder %s3106_s15, %s3102_s14 }
  0x59   : > { %p33_p4 = scmp.eq.s32.totalorder %s32_s24, 0  ;;  %p43_p13 = scmp.eq.s32.totalorder %s3110_s16, 0 }
  0x5a   : > { %p2878_p6 = scmp.lt.s32.totalorder %s3110_s16, 2  ;;  %p3831_p3 = scmp.eq.s32.totalorder %s3197_s17, 1 }
  0x5b   : > { %s3326_s13 = scalar_select %p33_p4, %s3106_s15, %s35_s10  }
  0x5c   : > { %p44_p10 = por %p43_p13, %p42_p8  ;;  %p3330_p5 = por %p3831_p3, %p42_p8 }
  0x5d   : > { %s344_s12 = sand.u32 1, %s3106_s15   ;;  %s2009_s18 = sshll.u32 %s3110_s16, 9 }
  0x5e   : > { %s1915_s28 = sshll.u32 %s344_s12, 5  ;;  %s3339_s29 = scalar_lea.hbm %s3805_s0, %s2009_s18 }
  0x5f   : > { %s348_s23 = scalar_lea.vmem [#allocation2], %s1915_s28  ;;  %p3341_p11 = pnand %p2878_p6, %p44_p10 }
  0x60   : > { %s355_s26 = sshll.u32 %s348_s23, 4  ;;  %s3347_s24 = scalar_lea.sflag [#allocation3], %s344_s12  ;;  %s3345_s26 = int_to_ptr.vmem [resolvable:$true] %s355_s26 }
  0x61   : > { %s3006_s10 = scalar_lea.hbm %s3339_s29, 512  ;;  %p3008_p9 = pneg %p3341_p11 }
  0x62   : > { %p3007_p7 = scmp.ne.s32.totalorder %s3339_s29, %s3006_s10  ;;  %s3011_s25 = scalar_lea.hbm %s3805_s0, 1024 }
  0x63   : > { %p3012_p1 = scmp.lt.u32.totalorder %s3339_s29, %s3805_s0  ;;  %p3013_p2 = scmp.lt.u32.totalorder %s3011_s25, %s3006_s10 }
  0x64   : > { %p3009_p12 = pnand %p3008_p9, %p3007_p7  ;;  %p3015_p8 = scmp.lt.u32.totalorder %s3006_s10, %s3339_s29 }
  0x65   : > { %p3014_p4 = por %p3013_p2, %p3012_p1 }
  0x66   : > { %p3010_p0 = pneg %p3009_p12 }
  0x67   : > { %p3016_p13 = por %p3015_p8, %p3014_p4 }
  0x69   : > { %p3017_p6 = pnand %p3016_p13, %p3010_p0 }
  0x6b   : > { %3020 = shalt.err (!%p3017_p6)
}
  0x6c   : > { %s3021_s12 = scalar_lea.vmem %s3345_s26, 512  ;;  %s3117_s18 = smov [#allocation2]  }
  0x6d   : > { %p3022_p10 = scmp.ne.s32.totalorder %s3345_s26, %s3021_s12  ;;  %s3026_s28 = sshll.u32 %s3117_s18, 4  ;;  %s3027_s28 = int_to_ptr.vmem [resolvable:$false] %s3026_s28 }
  0x6e   : > { %s3028_s27 = scalar_lea.vmem %s3027_s28, 1024  ;;  %p3029_p12 = scmp.lt.s32.totalorder %s3345_s26, %s3027_s28 }
  0x6f   : > { %p3024_p3 = pnand %p3022_p10, %p3008_p9  ;;  %p3030_p1 = scmp.lt.s32.totalorder %s3028_s27, %s3021_s12 }
  0x71   : > { %p3025_p7 = pneg %p3024_p3  ;;  %p3031_p2 = por %p3030_p1, %p3029_p12 }
  0x73   : > { %p3032_p4 = pnand %p3031_p2, %p3025_p7 }
  0x75   : > { %3035 = shalt.err (!%p3032_p4)
}
  0x76   : > { %2870 = dma.hbm_to_vmem [thread:$0]  (!%p3341_p11), %s3339_s29, 512, %s3345_s26, %s3347_s24, %s3115_s30, %s3115_s30, %s3116_s11  }
  0x77   : > { %p3834_p9 = scmp.ne.s32.totalorder %s3828_s21, 0 }
  0x78   : > { %s3381_s10 = sand.u32 (!%p3834_p9), 1, %s3102_s14   ;;  %p3835_p0 = scmp.ne.s32.totalorder (!%p3834_p9), %s3825_s19, 0 }
  0x79   : > { %367 = sbr.rel (%p3834_p9) target bundleno = 1585 (0x631), region = 60  ;;  %s1919_s25 = sshll.u32 (!%p3834_p9), %s3381_s10, 5 }
  0x7a   : > { %s370_s23 = scalar_lea.sflag (!%p3834_p9), [#allocation3], %s3381_s10  ;;  %s3387_s9 = scalar_lea.vmem (!%p3834_p9), [#allocation2], %s1919_s25 }
  0x80   : > { %3081 = dma.done.wait (%p3835_p0), %s370_s23, 512  }
  0x81   : > { %3083 = vsyncadd (%p3835_p0), %s370_s23, 4294966784  ;;  %p3836_p11 = scmp.eq.s32.totalorder %s3197_s17, 0 }
  0x83   : > { %3085 = dma.done.wait (%p3836_p11), [#allocation6], 3072   ;;  %p3837_p8 = pmov %p3836_p11 }
  0x85   : > { %3087 = vsyncadd (%p3837_p8), [#allocation6], 4294964224  ;;  %p3838_p13 = pmov %p3837_p8 }
  0x86   : > { %p3839_p6 = pmov %p3837_p8 }
  0x87   : > { %3089 = dma.done.wait (%p3838_p13), [#allocation9], 3072  }
  0x88   : > { %3091 = vsyncadd (%p3839_p6), [#allocation9], 4294964224  ;;  %v437_v0 = vld [vmem:[#allocation7] sm:$0xff]  ;;  %v438_v1 = vld [vmem:[#allocation7 + $0x8] sm:$0xff]  ;;  %vm549_vm0 = vcmask 261120   ;;  %vm1469_vm1 = vcmask 523264  }
  0x89   : > { %v439_v2 = vld [vmem:[#allocation7 + $0x10] sm:$0xff]  ;;  %v2549_v3 = vpack.c.bf16 %v438_v1, %v437_v0  ;;  %v440_v4 = vld [vmem:[#allocation7 + $0x18] sm:$0xff]  ;;  %v441_v6 = vld [vmem:[#allocation7 + $0x20] sm:$0xff]  ;;  %s421_s19 = scalar_lea.vmem [#allocation10], %s1919_s25  ;;  %s2010_s30 = sshll.u32 %s3197_s17, 9 }
  0x8a   : > { %v2553_v5 = vpack.c.bf16 %v440_v4, %v439_v2  ;;  %v442_v7 = vld [vmem:[#allocation7 + $0x28] sm:$0xff]  ;;  %v3402_v9 = vld [vmem:[%s3387_s9] sm:$0xff]  ;;  %v443_v10 = vld [vmem:[#allocation7 + $0x30] sm:$0xff]  ;;  %s1807_s21 = sshll.u32 %s421_s19, 4  ;;  %s3841_s29 = sld [smem:[#allocation18_spill]]  ;;  %s3754_s21 = int_to_ptr.vmem [resolvable:$true] %s1807_s21 }
  0x8b   : > { %2550 = vmatprep.subr.bf16.mxu1 %v2549_v3  ;;  %v2557_v8 = vpack.c.bf16 %v442_v7, %v441_v6  ;;  %v444_v11 = vld [vmem:[#allocation7 + $0x38] sm:$0xff]  ;;  %2231 = vmatprep.mubr.f32.mxu1 %v3402_v9  ;;  %v445_v13 = vld [vmem:[#allocation7 + $0x40] sm:$0xff]  ;;  %v446_v14 = vld [vmem:[#allocation7 + $0x48] sm:$0xff]  ;;  %s1794_s17 = scalar_lea.sflag [#allocation4], %s3381_s10  ;;  %s3036_s24 = scalar_lea.vmem %s3754_s21, 512 }
  0x8c   : > { %2552 = vmatpush3.bf16.msra.mxu1 %v2549_v3  ;;  %v2561_v12 = vpack.c.bf16 %v444_v11, %v443_v10  ;;  %v2565_v15 = vpack.c.bf16 %v446_v14, %v445_v13  ;;  %v447_v16 = vld [vmem:[#allocation7 + $0x50] sm:$0xff]  ;;  %v448_v17 = vld [vmem:[#allocation7 + $0x58] sm:$0xff]  ;;  %v449_v19 = vld [vmem:[#allocation7 + $0x60] sm:$0xff]  ;;  %p3037_p10 = scmp.ne.s32.totalorder %s3754_s21, %s3036_s24  ;;  %s3118_s12 = smov [#allocation10]  }
  0x8d   : > { %2554 = vmatprep.subr.bf16.mxu1 %v2553_v5  ;;  %v2569_v18 = vpack.c.bf16 %v448_v17, %v447_v16  ;;  %v450_v20 = vld [vmem:[#allocation7 + $0x68] sm:$0xff]  ;;  %v451_v22 = vld [vmem:[#allocation7 + $0x70] sm:$0xff]  ;;  %v452_v23 = vld [vmem:[#allocation7 + $0x78] sm:$0xff]  ;;  %s3040_s18 = sshll.u32 %s3118_s12, 4  ;;  %s3041_s18 = int_to_ptr.vmem [resolvable:$false] %s3040_s18 }
  0x8e   : > { %v2573_v21 = vpack.c.bf16 %v450_v20, %v449_v19  ;;  %v2577_v24 = vpack.c.bf16 %v452_v23, %v451_v22  ;;  %v3406_v25 = vld [vmem:[%s3387_s9 + $0x8] sm:$0xff]  ;;  %v3409_v26 = vld [vmem:[%s3387_s9 + $0x10] sm:$0xff]  ;;  %v3414_v27 = vld [vmem:[%s3387_s9 + $0x18] sm:$0xff]  ;;  %s3840_s9 = sld [smem:[#allocation17_spill]]  ;;  %p3038_p3 = pnand %p3037_p10, %p3330_p5 }
  0x8f   : > { %v3417_v28 = vld [vmem:[#allocation5] sm:$0xff]  ;;  %v1934_v44 = vld [vmem:[%s3809_s4 + $0x88] sm:$0xff]  ;;  %v1935_v48 = vld [vmem:[%s3809_s4 + $0x90] sm:$0xff]  ;;  %s3042_s28 = scalar_lea.vmem %s3041_s18, 1024  ;;  %p3043_p12 = scmp.lt.s32.totalorder %s3754_s21, %s3041_s18 }
  0x90   : > { %2556 = vmatpush3.bf16.msra.mxu1 %v2553_v5  ;;  %v3419_v29 = vld [vmem:[#allocation5 + $0x20] sm:$0xff]  ;;  %2245 = vmatprep.mubr.msk.f32.mxu0 %vm549_vm0, %v3417_v28  ;;  %v1936_v49 = vld [vmem:[%s3809_s4 + $0x98] sm:$0xff]  ;;  %v3452_v50 = vld [vmem:[#allocation5 + $0x8] sm:$0xff]  ;;  %s3760_s26 = scalar_lea.hbm %s3841_s29, %s2010_s30  ;;  %p3039_p7 = pneg %p3038_p3 }
  0x91   : > { %2558 = vmatprep.subr.bf16.mxu1 %v2557_v8  ;;  %v1924_v30 = vld [vmem:[%s3808_s3] ss:$0 sm:$0xff]  ;;  %v3454_v51 = vld [vmem:[#allocation5 + $0x28] sm:$0xff]  ;;  %v3456_v52 = vld [vmem:[#allocation5 + $0x30] sm:$0xff]  ;;  %v2601_v53 = vpack.c.bf16 %v1936_v49, %v1935_v48  ;;  %p3044_p1 = scmp.lt.s32.totalorder %s3042_s28, %s3036_s24 }
  0x92   : > { %v1933_v43 = vld [vmem:[%s3809_s4 + $0x80] sm:$0xff]  ;;  %v1938_v55 = vld [vmem:[%s3809_s4 + $0xa8] sm:$0xff]  ;;  %v3464_v56 = vld [vmem:[#allocation5 + $0x10] sm:$0xff] }
  0x93   : > { %v2597_v47 = vpack.c.bf16 %v1934_v44, %v1933_v43  ;;  %v1937_v54 = vld [vmem:[%s3809_s4 + $0xa0] sm:$0xff]  ;;  %v3472_v57 = vld [vmem:[#allocation5 + $0x38] sm:$0xff]  ;;  %v1939_v60 = vld [vmem:[%s3809_s4 + $0xb0] sm:$0xff]  ;;  %p3045_p2 = por %p3044_p1, %p3043_p12 }
  0x94   : > { %2560 = vmatpush3.bf16.msra.mxu1 %v2557_v8  ;;  %v3474_v58 = vld [vmem:[#allocation5 + $0x18] sm:$0xff]  ;;  %v2605_v59 = vpack.c.bf16 %v1938_v55, %v1937_v54  ;;  %v1941_v63 = vld [vmem:[%s3809_s4 + $0xc0] sm:$0xff]  ;;  %v1942_v0 = vld [vmem:[%s3809_s4 + $0xc8] sm:$0xff] }
  0x95   : > { %2562 = vmatprep.subr.bf16.mxu1 %v2561_v12  ;;  %v1940_v61 = vld [vmem:[%s3809_s4 + $0xb8] sm:$0xff]  ;;  %v2613_v1 = vpack.c.bf16 %v1942_v0, %v1941_v63  ;;  %v1943_v2 = vld [vmem:[%s3809_s4 + $0xd0] sm:$0xff]  ;;  %v1945_v5 = vld [vmem:[%s3809_s4 + $0xe0] sm:$0xff]  ;;  %p3046_p4 = pnand %p3045_p2, %p3039_p7 }
  0x96   : > { %v2609_v62 = vpack.c.bf16 %v1940_v61, %v1939_v60  ;;  %v1944_v3 = vld [vmem:[%s3809_s4 + $0xd8] sm:$0xff]  ;;  %v1946_v6 = vld [vmem:[%s3809_s4 + $0xe8] sm:$0xff]  ;;  %v1947_v8 = vld [vmem:[%s3809_s4 + $0xf0] sm:$0xff] }
  0x97   : > { %v2617_v4 = vpack.c.bf16 %v1944_v3, %v1943_v2  ;;  %v2621_v7 = vpack.c.bf16 %v1946_v6, %v1945_v5  ;;  %v1948_v10 = vld [vmem:[%s3809_s4 + $0xf8] sm:$0xff]  ;;  %v745_v13 = vld [vmem:[%s3809_s4 + $0x8] sm:$0xff]  ;;  %v1949_v44 = vld [vmem:[%s3809_s4 + $0x100] sm:$0xff] }
  0x98   : > { %2564 = vmatpush3.bf16.msra.mxu1 %v2561_v12  ;;  %v2625_v11 = vpack.c.bf16 %v1948_v10, %v1947_v8  ;;  %v744_v12 = vld [vmem:[%s3809_s4] sm:$0xff]  ;;  %v747_v16 = vld [vmem:[%s3809_s4 + $0x18] sm:$0xff]  ;;  %v749_v19 = vld [vmem:[%s3809_s4 + $0x28] sm:$0xff] }
  0x99   : > { %2566 = vmatprep.subr.bf16.mxu1 %v2565_v15  ;;  %v2629_v14 = vpack.c.bf16 %v745_v13, %v744_v12  ;;  %v751_v22 = vld [vmem:[%s3809_s4 + $0x38] sm:$0xff]  ;;  %v1966_v48 = vld [vmem:[%s3811_s6 + $0x80] sm:$0xff]  ;;  %v1967_v49 = vld [vmem:[%s3811_s6 + $0x88] sm:$0xff] }
  0x9a   : > { %v2693_v54 = vpack.c.bf16 %v1967_v49, %v1966_v48  ;;  %v1969_v55 = vld [vmem:[%s3811_s6 + $0x98] sm:$0xff]  ;;  %v1970_v60 = vld [vmem:[%s3811_s6 + $0xa0] sm:$0xff]  ;;  %v1971_v61 = vld [vmem:[%s3811_s6 + $0xa8] sm:$0xff] }
  0x9b   : > { %v1972_v63 = vld [vmem:[%s3811_s6 + $0xb0] sm:$0xff]  ;;  %v1973_v0 = vld [vmem:[%s3811_s6 + $0xb8] sm:$0xff]  ;;  %v1974_v2 = vld [vmem:[%s3811_s6 + $0xc0] sm:$0xff] }
  0x9c   : > { %2568 = vmatpush3.bf16.msra.mxu1 %v2565_v15  ;;  %v746_v15 = vld [vmem:[%s3809_s4 + $0x10] sm:$0xff]  ;;  %v1975_v3 = vld [vmem:[%s3811_s6 + $0xc8] sm:$0xff]  ;;  %v1977_v6 = vld [vmem:[%s3811_s6 + $0xd8] sm:$0xff] }
  0x9d   : > { %2570 = vmatprep.subr.bf16.mxu1 %v2569_v18  ;;  %v2633_v17 = vpack.c.bf16 %v747_v16, %v746_v15  ;;  %v1976_v5 = vld [vmem:[%s3811_s6 + $0xd0] sm:$0xff]  ;;  %v1978_v8 = vld [vmem:[%s3811_s6 + $0xe0] sm:$0xff]  ;;  %v1979_v10 = vld [vmem:[%s3811_s6 + $0xe8] sm:$0xff] }
  0x9e   : > { %v1951_v12 = vld [vmem:[%s3809_s4 + $0x110] sm:$0xff]  ;;  %v1952_v13 = vld [vmem:[%s3809_s4 + $0x118] sm:$0xff] }
  0x9f   : > { %v1964_v48 = vld [vmem:[%s3809_s4 + $0x178] sm:$0xff] }
  0xa0   : > { %2572 = vmatpush3.bf16.msra.mxu1 %v2569_v18  ;;  %v748_v18 = vld [vmem:[%s3809_s4 + $0x20] sm:$0xff] }
  0xa1   : > { %2574 = vmatprep.subr.bf16.mxu1 %v2573_v21  ;;  %v2637_v20 = vpack.c.bf16 %v749_v19, %v748_v18  ;;  %v1953_v19 = vld [vmem:[%s3809_s4 + $0x120] sm:$0xff] }
  0xa4   : > { %2576 = vmatpush3.bf16.msra.mxu1 %v2573_v21  ;;  %v750_v21 = vld [vmem:[%s3809_s4 + $0x30] sm:$0xff] }
  0xa5   : > { %2578 = vmatprep.subr.bf16.mxu1 %v2577_v24  ;;  %v2641_v23 = vpack.c.bf16 %v751_v22, %v750_v21 }
  0xa8   : > { %2580 = vmatpush3.bf16.msra.mxu1 %v2577_v24  ;;  %v752_v24 = vld [vmem:[%s3809_s4 + $0x40] sm:$0xff] }
  0xab   : > { %2232 = vmatmul.mubr.f32.vlgmr.msra.gmra.mrb[0].mxu1 %v3406_v25 }
  0xac   : > { %2234 = vmatprep.mubr.f32.mxu1 %v3409_v26 }
  0xaf   : > { %2235 = vmatmul.mubr.f32.gmra.mrb[2].mxu1 %v3414_v27 }
  0xb0   : > { %2259 = vmatprep.mubr.msk.f32.mxu1 %vm549_vm0, %v3419_v29 }
 0x17e   : > { %v2233_v31 = vpop.f32.mrb[0].mxu1 }
 0x17f   : > { %v532_v32 = vadd.f32 %v2233_v31, %v1924_v30  ;;  %v526_v33 = vpop.f32.mrb[1].mxu1 }
 0x180   : > { %v527_v34 = vadd.f32 %v1924_v30, %v526_v33  ;;  %v755_v33 = vld [vmem:[%s3809_s4 + $0x58] sm:$0xff] }
 0x181   : > { %v3428_v35 = vmax.f32 %v532_v32, 0.0  ;;  %v754_v32 = vld [vmem:[%s3809_s4 + $0x50] sm:$0xff] }
 0x182   : > { %v3430_v36 = vmax.f32 %v527_v34, 0.0  ;;  %v2236_v37 = vpop.f32.mrb[2].mxu1  ;;  %v2649_v34 = vpack.c.bf16 %v755_v33, %v754_v32  ;;  %v1956_v32 = vld [vmem:[%s3809_s4 + $0x138] sm:$0xff] }
 0x183   : > { %v542_v38 = vadd.f32 %v2236_v37, %v1924_v30  ;;  %v536_v39 = vpop.f32.mrb[3].mxu1  ;;  %v756_v37 = vld [vmem:[%s3809_s4 + $0x60] sm:$0xff] }
 0x184   : > { %v2581_v40 = vpack.c.bf16 %v3428_v35, %v3430_v36  ;;  %v537_v41 = vadd.f32 %v1924_v30, %v536_v39  ;;  %v753_v30 = vld [vmem:[%s3809_s4 + $0x48] sm:$0xff] }
 0x185   : > { %v3434_v42 = vmax.f32 %v542_v38, 0.0  ;;  %v2645_v31 = vpack.c.bf16 %v753_v30, %v752_v24  ;;  %v757_v38 = vld [vmem:[%s3809_s4 + $0x68] sm:$0xff] }
 0x186   : > { %v3442_v45 = vmax.f32 %v537_v41, 0.0  ;;  %2582 = vmatprep.subr.bf16.mxu0 %v2581_v40  ;;  %2590 = vmatprep.subr.bf16.mxu1 %v2581_v40  ;;  %v2653_v39 = vpack.c.bf16 %v757_v38, %v756_v37  ;;  %v759_v41 = vld [vmem:[%s3809_s4 + $0x78] sm:$0xff]  ;;  %v1958_v37 = vld [vmem:[%s3809_s4 + $0x148] sm:$0xff] }
 0x187   : > { %2584 = vmatpush3.bf16.msra.mxu0 %v2581_v40  ;;  %2592 = vmatpush3.bf16.msra.mxu1 %v2581_v40  ;;  %v758_v40 = vld [vmem:[%s3809_s4 + $0x70] sm:$0xff] }
 0x188   : > { %v2585_v46 = vpack.c.bf16 %v3434_v42, %v3442_v45  ;;  %v2657_v43 = vpack.c.bf16 %v759_v41, %v758_v40  ;;  %v1960_v40 = vld [vmem:[%s3809_s4 + $0x158] sm:$0xff] }
 0x18a   : > { %2586 = vmatprep.subr.bf16.mxu0 %v2585_v46  ;;  %2594 = vmatprep.subr.bf16.mxu1 %v2585_v46 }
 0x18b   : > { %2588 = vmatpush3.bf16.msra.mxu0 %v2585_v46  ;;  %2596 = vmatpush3.bf16.msra.mxu1 %v2585_v46  ;;  %v1950_v46 = vld [vmem:[%s3809_s4 + $0x108] sm:$0xff] }
 0x18c   : > { %2598 = vmatprep.subr.bf16.mxu1 %v2597_v47  ;;  %2694 = vmatprep.subr.bf16.mxu0 %v2693_v54 }
 0x18e   : > { %2246 = vmatmul.mubr.msk.f32.vlgmr.msra.gmra.mrb[0].mxu0 %vm549_vm0, %v3452_v50  ;;  %2260 = vmatmul.mubr.msk.f32.vlgmr.msra.gmra.mrb[4].mxu1 %vm549_vm0, %v3454_v51 }
 0x18f   : > { %2600 = vmatpush3.bf16.msra.mxu1 %v2597_v47  ;;  %2262 = vmatprep.mubr.msk.f32.mxu1 %vm549_vm0, %v3456_v52  ;;  %v2661_v47 = vpack.c.bf16 %v1950_v46, %v1949_v44  ;;  %v1962_v44 = vld [vmem:[%s3809_s4 + $0x168] sm:$0xff] }
 0x190   : > { %2602 = vmatprep.subr.bf16.mxu1 %v2601_v53  ;;  %2248 = vmatprep.mubr.msk.f32.mxu0 %vm549_vm0, %v3464_v56 }
 0x191   : > { %2696 = vmatpush3.bf16.msra.mxu0 %v2693_v54  ;;  %v1981_v54 = vld [vmem:[%s3811_s6 + $0xf8] sm:$0xff] }
 0x192   : > { %2263 = vmatmul.mubr.msk.f32.gmra.mrb[6].mxu1 %vm549_vm0, %v3472_v57  ;;  %2249 = vmatmul.mubr.msk.f32.gmra.mrb[2].mxu0 %vm549_vm0, %v3474_v58 }
 0x193   : > { %2604 = vmatpush3.bf16.msra.mxu1 %v2601_v53  ;;  %2297 = vmatprep.mubr.f32.mxu1 %v3430_v36  ;;  %v1968_v53 = vld [vmem:[%s3811_s6 + $0x90] sm:$0xff] }
 0x194   : > { %2606 = vmatprep.subr.bf16.mxu1 %v2605_v59 }
 0x197   : > { %2608 = vmatpush3.bf16.msra.mxu1 %v2605_v59  ;;  %v2697_v59 = vpack.c.bf16 %v1969_v55, %v1968_v53  ;;  %v1980_v53 = vld [vmem:[%s3811_s6 + $0xf0] sm:$0xff] }
 0x198   : > { %2610 = vmatprep.subr.bf16.mxu1 %v2609_v62  ;;  %v2721_v55 = vpack.c.bf16 %v1981_v54, %v1980_v53  ;;  %v1463_v54 = vld [vmem:[#allocation8 + $0x50] sm:$0xff] }
 0x199   : > { %2698 = vmatprep.subr.bf16.mxu0 %v2697_v59 }
 0x19a   : > { %2700 = vmatpush3.bf16.msra.mxu0 %v2697_v59  ;;  %v1068_v59 = vld [vmem:[%s3811_s6] sm:$0xff] }
 0x19b   : > { %2612 = vmatpush3.bf16.msra.mxu1 %v2609_v62  ;;  %v2701_v62 = vpack.c.bf16 %v1971_v61, %v1970_v60  ;;  %v1069_v60 = vld [vmem:[%s3811_s6 + $0x8] sm:$0xff] }
 0x19c   : > { %2614 = vmatprep.subr.bf16.mxu1 %v2613_v1  ;;  %v2725_v61 = vpack.c.bf16 %v1069_v60, %v1068_v59  ;;  %v1465_v60 = vld [vmem:[#allocation8 + $0x60] sm:$0xff] }
 0x19d   : > { %2702 = vmatprep.subr.bf16.mxu0 %v2701_v62 }
 0x19e   : > { %2704 = vmatpush3.bf16.msra.mxu0 %v2701_v62  ;;  %v1965_v62 = vld [vmem:[%s3810_s5] ss:$0 sm:$0xff] }
 0x19f   : > { %2616 = vmatpush3.bf16.msra.mxu1 %v2613_v1  ;;  %v2705_v1 = vpack.c.bf16 %v1973_v0, %v1972_v63 }
 0x1a0   : > { %2618 = vmatprep.subr.bf16.mxu1 %v2617_v4 }
 0x1a1   : > { %2706 = vmatprep.subr.bf16.mxu0 %v2705_v1 }
 0x1a2   : > { %2708 = vmatpush3.bf16.msra.mxu0 %v2705_v1 }
 0x1a3   : > { %2620 = vmatpush3.bf16.msra.mxu1 %v2617_v4  ;;  %v2709_v4 = vpack.c.bf16 %v1975_v3, %v1974_v2  ;;  %v1070_v3 = vld [vmem:[%s3811_s6 + $0x10] sm:$0xff] }
 0x1a4   : > { %2622 = vmatprep.subr.bf16.mxu1 %v2621_v7 }
 0x1a5   : > { %2710 = vmatprep.subr.bf16.mxu0 %v2709_v4 }
 0x1a6   : > { %2712 = vmatpush3.bf16.msra.mxu0 %v2709_v4  ;;  %v1071_v4 = vld [vmem:[%s3811_s6 + $0x18] sm:$0xff] }
 0x1a7   : > { %2624 = vmatpush3.bf16.msra.mxu1 %v2621_v7  ;;  %v2713_v7 = vpack.c.bf16 %v1977_v6, %v1976_v5 }
 0x1a8   : > { %2626 = vmatprep.subr.bf16.mxu1 %v2625_v11 }
 0x1a9   : > { %2714 = vmatprep.subr.bf16.mxu0 %v2713_v7 }
 0x1aa   : > { %2716 = vmatpush3.bf16.msra.mxu0 %v2713_v7 }
 0x1ab   : > { %2628 = vmatpush3.bf16.msra.mxu1 %v2625_v11  ;;  %v2717_v11 = vpack.c.bf16 %v1979_v10, %v1978_v8 }
 0x1ac   : > { %2630 = vmatprep.subr.bf16.mxu1 %v2629_v14 }
 0x1ad   : > { %2718 = vmatprep.subr.bf16.mxu0 %v2717_v11 }
 0x1ae   : > { %2298 = vmatmul.mubr.f32.vlgmr.msra.gmra.mrb[8].mxu1 %v3428_v35  ;;  %2720 = vmatpush3.bf16.msra.mxu0 %v2717_v11  ;;  %v2729_v11 = vpack.c.bf16 %v1071_v4, %v1070_v3  ;;  %v1457_v3 = vld [vmem:[#allocation8 + $0x28] sm:$0xff]  ;;  %v1458_v4 = vld [vmem:[#allocation8 + $0x30] sm:$0xff] }
 0x1af   : > { %2300 = vmatprep.mubr.f32.mxu1 %v3442_v45  ;;  %2632 = vmatpush3.bf16.msra.mxu1 %v2629_v14 }
 0x1b0   : > { %2634 = vmatprep.subr.bf16.mxu1 %v2633_v17  ;;  %2722 = vmatprep.subr.bf16.mxu0 %v2721_v55 }
 0x1b2   : > { %2301 = vmatmul.mubr.f32.gmra.mrb[10].mxu1 %v3434_v42  ;;  %2724 = vmatpush3.bf16.msra.mxu0 %v2721_v55  ;;  %v1464_v55 = vld [vmem:[#allocation8 + $0x58] sm:$0xff] }
 0x1b3   : > { %2636 = vmatpush3.bf16.msra.mxu1 %v2633_v17  ;;  %v2665_v17 = vpack.c.bf16 %v1952_v13, %v1951_v12  ;;  %2726 = vmatprep.subr.bf16.mxu0 %v2725_v61  ;;  %v1072_v13 = vld [vmem:[%s3811_s6 + $0x20] sm:$0xff]  ;;  %v2777_v59 = vpack.c.bf16 %v1464_v55, %v1463_v54 }
 0x1b4   : > { %2638 = vmatprep.subr.bf16.mxu1 %v2637_v20 }
 0x1b7   : > { %2640 = vmatpush3.bf16.msra.mxu1 %v2637_v20  ;;  %v1954_v20 = vld [vmem:[%s3809_s4 + $0x128] sm:$0xff] }
 0x1b8   : > { %2642 = vmatprep.subr.bf16.mxu1 %v2641_v23 }
 0x1bb   : > { %2644 = vmatpush3.bf16.msra.mxu1 %v2641_v23  ;;  %v2669_v23 = vpack.c.bf16 %v1954_v20, %v1953_v19  ;;  %v1075_v19 = vld [vmem:[%s3811_s6 + $0x38] sm:$0xff] }
 0x1bc   : > { %2646 = vmatprep.subr.bf16.mxu1 %v2645_v31 }
 0x1bf   : > { %2648 = vmatpush3.bf16.msra.mxu1 %v2645_v31  ;;  %v1955_v31 = vld [vmem:[%s3809_s4 + $0x130] sm:$0xff] }
 0x1c0   : > { %2650 = vmatprep.subr.bf16.mxu1 %v2649_v34  ;;  %v2673_v33 = vpack.c.bf16 %v1956_v32, %v1955_v31  ;;  %v1080_v31 = vld [vmem:[%s3811_s6 + $0x60] sm:$0xff]  ;;  %v1081_v32 = vld [vmem:[%s3811_s6 + $0x68] sm:$0xff] }
 0x1c3   : > { %2652 = vmatpush3.bf16.msra.mxu1 %v2649_v34  ;;  %v1957_v34 = vld [vmem:[%s3809_s4 + $0x140] sm:$0xff] }
 0x1c4   : > { %2654 = vmatprep.subr.bf16.mxu1 %v2653_v39  ;;  %v2677_v38 = vpack.c.bf16 %v1958_v37, %v1957_v34  ;;  %v1082_v34 = vld [vmem:[%s3811_s6 + $0x70] sm:$0xff]  ;;  %v1083_v37 = vld [vmem:[%s3811_s6 + $0x78] sm:$0xff] }
 0x1c7   : > { %2656 = vmatpush3.bf16.msra.mxu1 %v2653_v39  ;;  %v1959_v39 = vld [vmem:[%s3809_s4 + $0x150] sm:$0xff] }
 0x1c8   : > { %2658 = vmatprep.subr.bf16.mxu1 %v2657_v43  ;;  %v2681_v41 = vpack.c.bf16 %v1960_v40, %v1959_v39  ;;  %v1982_v39 = vld [vmem:[%s3812_s7] ss:$0 sm:$0xff] }
 0x1cb   : > { %2660 = vmatpush3.bf16.msra.mxu1 %v2657_v43  ;;  %v1961_v43 = vld [vmem:[%s3809_s4 + $0x160] sm:$0xff] }
 0x1cc   : > { %2662 = vmatprep.subr.bf16.mxu1 %v2661_v47  ;;  %v2685_v46 = vpack.c.bf16 %v1962_v44, %v1961_v43 }
 0x261   : > { %v2247_v14 = vpop.f32.mrb[0].mxu0  ;;  %v2261_v15 = vpop.f32.mrb[4].mxu1 }
 0x262   : > { %v628_v16 = vpop.f32.mrb[1].mxu0  ;;  %v725_v18 = vpop.f32.mrb[5].mxu1 }
 0x263   : > { %2335 = vmatprep.mubr.f32.mxu1 %v628_v16 }
 0x264   : > { %2336 = vmatmul.mubr.f32.vlgmr.msra.gmra.mrb[8].mxu1 %v2247_v14  ;;  %v1073_v14 = vld [vmem:[%s3811_s6 + $0x28] sm:$0xff] }
 0x265   : > { %2664 = vmatpush3.bf16.msra.mxu1 %v2661_v47  ;;  %v2250_v21 = vpop.f32.mrb[2].mxu0  ;;  %v2264_v22 = vpop.f32.mrb[6].mxu1  ;;  %v1963_v47 = vld [vmem:[%s3809_s4 + $0x170] sm:$0xff] }
 0x266   : > { %2666 = vmatprep.subr.bf16.mxu1 %v2665_v17  ;;  %v638_v24 = vpop.f32.mrb[3].mxu0  ;;  %v735_v30 = vpop.f32.mrb[7].mxu1  ;;  %v2689_v49 = vpack.c.bf16 %v1964_v48, %v1963_v47 }
 0x267   : > { %2338 = vmatprep.mubr.f32.mxu1 %v638_v24  ;;  %v1078_v24 = vld [vmem:[%s3811_s6 + $0x50] sm:$0xff] }
 0x268   : > { %2339 = vmatmul.mubr.f32.gmra.mrb[10].mxu1 %v2250_v21  ;;  %v1076_v21 = vld [vmem:[%s3811_s6 + $0x40] sm:$0xff] }
 0x269   : > { %2668 = vmatpush3.bf16.msra.mxu1 %v2665_v17  ;;  %2373 = vmatprep.mubr.f32.mxu1 %v725_v18  ;;  %v2733_v17 = vpack.c.bf16 %v1073_v14, %v1072_v13  ;;  %v1074_v18 = vld [vmem:[%s3811_s6 + $0x30] sm:$0xff] }
 0x26a   : > { %2670 = vmatprep.subr.bf16.mxu1 %v2669_v23  ;;  %v2737_v20 = vpack.c.bf16 %v1075_v19, %v1074_v18 }
 0x26d   : > { %2672 = vmatpush3.bf16.msra.mxu1 %v2669_v23 }
 0x26e   : > { %2674 = vmatprep.subr.bf16.mxu1 %v2673_v33 }
 0x271   : > { %2676 = vmatpush3.bf16.msra.mxu1 %v2673_v33  ;;  %v2749_v33 = vpack.c.bf16 %v1081_v32, %v1080_v31  ;;  %v2003_v32 = vld [vmem:[%s3840_s9] ss:$0 sm:$0xff] }
 0x272   : > { %2678 = vmatprep.subr.bf16.mxu1 %v2677_v38 }
 0x275   : > { %2680 = vmatpush3.bf16.msra.mxu1 %v2677_v38  ;;  %v2753_v38 = vpack.c.bf16 %v1083_v37, %v1082_v34 }
 0x276   : > { %2682 = vmatprep.subr.bf16.mxu1 %v2681_v41 }
 0x279   : > { %2684 = vmatpush3.bf16.msra.mxu1 %v2681_v41 }
 0x27a   : > { %2686 = vmatprep.subr.bf16.mxu1 %v2685_v46 }
 0x27d   : > { %2688 = vmatpush3.bf16.msra.mxu1 %v2685_v46 }
 0x27e   : > { %2690 = vmatprep.subr.bf16.mxu1 %v2689_v49 }
 0x281   : > { %2692 = vmatpush3.bf16.msra.mxu1 %v2689_v49 }
 0x284   : > { %2374 = vmatmul.mubr.f32.vlgmr.msra.gmra.mrb[8].mxu1 %v2261_v15 }
 0x285   : > { %2376 = vmatprep.mubr.f32.mxu1 %v735_v30 }
 0x288   : > { %2377 = vmatmul.mubr.f32.gmra.mrb[10].mxu1 %v2264_v22  ;;  %v1077_v22 = vld [vmem:[%s3811_s6 + $0x48] sm:$0xff] }
 0x289   : > { %v2741_v23 = vpack.c.bf16 %v1077_v22, %v1076_v21  ;;  %v1671_v21 = vld [vmem:[#allocation8 + $0xb0] sm:$0xff]  ;;  %v1672_v22 = vld [vmem:[#allocation8 + $0xb8] sm:$0xff] }
 0x357   : > { %v2375_v63 = vpop.f32.mrb[8].mxu1 }
 0x358   : > { %v1061_v0 = vadd.f32 %v2375_v63, %v1965_v62  ;;  %v1030_v1 = vpop.f32.mrb[9].mxu1  ;;  %v1453_v63 = vld [vmem:[#allocation8 + $0x8] sm:$0xff] }
 0x359   : > { %v1060_v2 = vadd.f32 %v1965_v62, %v1030_v1 }
 0x35a   : > { %v1065_v7 = vmax.f32 %v1061_v0, 0.0  ;;  %v1454_v0 = vld [vmem:[#allocation8 + $0x10] sm:$0xff] }
 0x35b   : > { %v1064_v5 = vmax.f32 %v1060_v2, 0.0  ;;  %v2378_v6 = vpop.f32.mrb[10].mxu1  ;;  %v1456_v2 = vld [vmem:[#allocation8 + $0x20] sm:$0xff] }
 0x35c   : > { %v1063_v8 = vadd.f32 %v2378_v6, %v1965_v62  ;;  %v1040_v10 = vpop.f32.mrb[11].mxu1 }
 0x35d   : > { %v1062_v12 = vadd.f32 %v1965_v62, %v1040_v10  ;;  %2411 = vmatprep.mubr.f32.mxu0 %v1064_v5  ;;  %v1452_v62 = vld [vmem:[#allocation8] sm:$0xff]  ;;  %v1459_v5 = vld [vmem:[#allocation8 + $0x38] sm:$0xff] }
 0x35e   : > { %2412 = vmatmul.mubr.f32.vlgmr.msra.gmra.mrb[4].mxu0 %v1065_v7  ;;  %v1067_v16 = vmax.f32 %v1063_v8, 0.0  ;;  %v2801_v6 = vpack.c.bf16 %v1459_v5, %v1458_v4  ;;  %v1665_v7 = vld [vmem:[#allocation8 + $0x80] sm:$0xff]  ;;  %v1666_v8 = vld [vmem:[#allocation8 + $0x88] sm:$0xff] }
 0x35f   : > { %v1066_v15 = vmax.f32 %v1062_v12, 0.0  ;;  %2728 = vmatpush3.bf16.msra.mxu0 %v2725_v61  ;;  %v1466_v61 = vld [vmem:[#allocation8 + $0x68] sm:$0xff]  ;;  %v2805_v10 = vpack.c.bf16 %v1666_v8, %v1665_v7  ;;  %v1668_v12 = vld [vmem:[#allocation8 + $0x98] sm:$0xff] }
 0x360   : > { %2730 = vmatprep.subr.bf16.mxu0 %v2729_v11 }
 0x361   : > { %2414 = vmatprep.mubr.f32.mxu0 %v1066_v15 }
 0x362   : > { %2415 = vmatmul.mubr.f32.gmra.mrb[6].mxu0 %v1067_v16  ;;  %v1669_v16 = vld [vmem:[#allocation8 + $0xa0] sm:$0xff] }
 0x363   : > { %2732 = vmatpush3.bf16.msra.mxu0 %v2729_v11  ;;  %2449 = vmatprep.mubr.f32.mxu0 %v3430_v36  ;;  %v1079_v36 = vld [vmem:[%s3811_s6 + $0x58] sm:$0xff]  ;;  %v1667_v11 = vld [vmem:[#allocation8 + $0x90] sm:$0xff] }
 0x364   : > { %2734 = vmatprep.subr.bf16.mxu0 %v2733_v17  ;;  %v2745_v30 = vpack.c.bf16 %v1079_v36, %v1078_v24  ;;  %v2809_v15 = vpack.c.bf16 %v1668_v12, %v1667_v11  ;;  %v2817_v24 = vpack.c.bf16 %v1672_v22, %v1671_v21 }
 0x367   : > { %2736 = vmatpush3.bf16.msra.mxu0 %v2733_v17  ;;  %v1670_v17 = vld [vmem:[#allocation8 + $0xa8] sm:$0xff] }
 0x368   : > { %2738 = vmatprep.subr.bf16.mxu0 %v2737_v20  ;;  %v2813_v19 = vpack.c.bf16 %v1670_v17, %v1669_v16 }
 0x36b   : > { %2740 = vmatpush3.bf16.msra.mxu0 %v2737_v20 }
 0x36c   : > { %2742 = vmatprep.subr.bf16.mxu0 %v2741_v23 }
 0x36f   : > { %2744 = vmatpush3.bf16.msra.mxu0 %v2741_v23 }
 0x370   : > { %2746 = vmatprep.subr.bf16.mxu0 %v2745_v30 }
 0x373   : > { %2748 = vmatpush3.bf16.msra.mxu0 %v2745_v30 }
 0x374   : > { %2750 = vmatprep.subr.bf16.mxu0 %v2749_v33 }
 0x377   : > { %2752 = vmatpush3.bf16.msra.mxu0 %v2749_v33 }
 0x378   : > { %2754 = vmatprep.subr.bf16.mxu0 %v2753_v38 }
 0x37b   : > { %2756 = vmatpush3.bf16.msra.mxu0 %v2753_v38 }
 0x37e   : > { %2450 = vmatmul.mubr.f32.vlgmr.msra.gmra.mrb[4].mxu0 %v3428_v35 }
 0x37f   : > { %2452 = vmatprep.mubr.f32.mxu0 %v3442_v45 }
 0x382   : > { %2453 = vmatmul.mubr.f32.gmra.mrb[6].mxu0 %v3434_v42  ;;  %v1462_v42 = vld [vmem:[#allocation8 + $0x48] sm:$0xff] }
 0x383   : > { %2463 = vmatprep.mubr.msk.f32.mxu0 %vm549_vm0, %v3417_v28  ;;  %v1461_v28 = vld [vmem:[#allocation8 + $0x40] sm:$0xff] }
 0x384   : > { %v2773_v53 = vpack.c.bf16 %v1462_v42, %v1461_v28 }
 0x451   : > { %v2451_v40 = vpop.f32.mrb[4].mxu0 }
 0x452   : > { %v1279_v41 = vadd.f32 %v2451_v40, %v1982_v39  ;;  %v1252_v43 = vpop.f32.mrb[5].mxu0 }
 0x453   : > { %v1278_v44 = vadd.f32 %v1982_v39, %v1252_v43 }
 0x455   : > { %v2757_v46 = vpack.c.bf16 %v1279_v41, %v1278_v44  ;;  %v2454_v47 = vpop.f32.mrb[6].mxu0 }
 0x456   : > { %v1281_v48 = vadd.f32 %v2454_v47, %v1982_v39  ;;  %v1262_v49 = vpop.f32.mrb[7].mxu0 }
 0x457   : > { %v1280_v35 = vadd.f32 %v1982_v39, %v1262_v49  ;;  %2758 = vmatprep.subr.bf16.mxu0 %v2757_v46 }
 0x458   : > { %2760 = vmatpush3.bf16.msra.mxu0 %v2757_v46 }
 0x459   : > { %v2761_v45 = vpack.c.bf16 %v1281_v48, %v1280_v35 }
 0x45b   : > { %2762 = vmatprep.subr.bf16.mxu0 %v2761_v45 }
 0x45c   : > { %2764 = vmatpush3.bf16.msra.mxu0 %v2761_v45 }
 0x45d   : > { %2766 = vmatprep.subr.bf16.mxu0 %v2757_v46 }
 0x45f   : > { %2464 = vmatmul.mubr.msk.f32.vlgmr.msra.gmra.mrb[8].mxu0 %vm549_vm0, %v3452_v50  ;;  %v2781_v50 = vpack.c.bf16 %v1466_v61, %v1465_v60 }
 0x460   : > { %2768 = vmatpush3.bf16.msra.mxu0 %v2757_v46  ;;  %2466 = vmatprep.mubr.msk.f32.mxu0 %vm549_vm0, %v3464_v56  ;;  %v1467_v56 = vld [vmem:[#allocation8 + $0x70] sm:$0xff] }
 0x461   : > { %2770 = vmatprep.subr.bf16.mxu0 %v2761_v45 }
 0x463   : > { %2467 = vmatmul.mubr.msk.f32.gmra.mrb[10].mxu0 %vm549_vm0, %v3474_v58  ;;  %v1468_v58 = vld [vmem:[#allocation8 + $0x78] sm:$0xff] }
 0x464   : > { %2772 = vmatpush3.bf16.msra.mxu0 %v2761_v45  ;;  %2477 = vmatprep.mubr.msk.f32.mxu0 %vm549_vm0, %v3419_v29  ;;  %v2785_v29 = vpack.c.bf16 %v1468_v58, %v1467_v56 }
 0x465   : > { %2774 = vmatprep.subr.bf16.mxu0 %v2773_v53 }
 0x467   : > { %2478 = vmatmul.mubr.msk.f32.vlgmr.msra.gmra.mrb[12].mxu0 %vm549_vm0, %v3454_v51  ;;  %v2789_v51 = vpack.c.bf16 %v1453_v63, %v1452_v62 }
 0x468   : > { %2776 = vmatpush3.bf16.msra.mxu0 %v2773_v53  ;;  %2480 = vmatprep.mubr.msk.f32.mxu0 %vm549_vm0, %v3456_v52  ;;  %v1455_v52 = vld [vmem:[#allocation8 + $0x18] sm:$0xff] }
 0x469   : > { %2778 = vmatprep.subr.bf16.mxu0 %v2777_v59  ;;  %v2793_v1 = vpack.c.bf16 %v1455_v52, %v1454_v0 }
 0x46b   : > { %2481 = vmatmul.mubr.msk.f32.gmra.mrb[14].mxu0 %vm549_vm0, %v3472_v57  ;;  %v2797_v57 = vpack.c.bf16 %v1457_v3, %v1456_v2 }
 0x46c   : > { %2780 = vmatpush3.bf16.msra.mxu0 %v2777_v59  ;;  %2499 = vmatprep.mubr.msk.f32.mxu0 %vm1469_vm1, %v1278_v44 }
 0x46d   : > { %2782 = vmatprep.subr.bf16.mxu0 %v2781_v50 }
 0x470   : > { %2784 = vmatpush3.bf16.msra.mxu0 %v2781_v50 }
 0x471   : > { %2786 = vmatprep.subr.bf16.mxu0 %v2785_v29 }
 0x474   : > { %2788 = vmatpush3.bf16.msra.mxu0 %v2785_v29 }
 0x475   : > { %2790 = vmatprep.subr.bf16.mxu0 %v2789_v51 }
 0x477   : > { %2500 = vmatmul.mubr.msk.f32.vlgmr.msra.gmra.mrb[16].mxu0 %vm1469_vm1, %v1279_v41 }
 0x478   : > { %2502 = vmatprep.mubr.msk.f32.mxu0 %vm1469_vm1, %v1280_v35  ;;  %2792 = vmatpush3.bf16.msra.mxu0 %v2789_v51 }
 0x479   : > { %2794 = vmatprep.subr.bf16.mxu0 %v2793_v1 }
 0x47b   : > { %2503 = vmatmul.mubr.msk.f32.gmra.mrb[18].mxu0 %vm1469_vm1, %v1281_v48 }
 0x47c   : > { %2796 = vmatpush3.bf16.msra.mxu0 %v2793_v1 }
 0x47d   : > { %2798 = vmatprep.subr.bf16.mxu0 %v2797_v57 }
 0x480   : > { %2800 = vmatpush3.bf16.msra.mxu0 %v2797_v57 }
 0x481   : > { %2802 = vmatprep.subr.bf16.mxu0 %v2801_v6 }
 0x484   : > { %2804 = vmatpush3.bf16.msra.mxu0 %v2801_v6 }
 0x485   : > { %2806 = vmatprep.subr.bf16.mxu0 %v2805_v10 }
 0x532   : > { %v2465_v13 = vpop.f32.mrb[8].mxu0 }
 0x533   : > { %v1348_v14 = vpop.f32.mrb[9].mxu0 }
 0x534   : > { %2521 = vmatprep.mubr.msk.f32.mxu0 %vm1469_vm1, %v1348_v14 }
 0x535   : > { %2522 = vmatmul.mubr.msk.f32.vlgmr.msra.gmra.mrb[16].mxu0 %vm1469_vm1, %v2465_v13 }
 0x536   : > { %2808 = vmatpush3.bf16.msra.mxu0 %v2805_v10  ;;  %v2468_v18 = vpop.f32.mrb[10].mxu0 }
 0x537   : > { %2810 = vmatprep.subr.bf16.mxu0 %v2809_v15  ;;  %v1358_v20 = vpop.f32.mrb[11].mxu0 }
 0x538   : > { %2524 = vmatprep.mubr.msk.f32.mxu0 %vm1469_vm1, %v1358_v20 }
 0x539   : > { %2525 = vmatmul.mubr.msk.f32.gmra.mrb[18].mxu0 %vm1469_vm1, %v2468_v18 }
 0x53a   : > { %2812 = vmatpush3.bf16.msra.mxu0 %v2809_v15  ;;  %v2479_v23 = vpop.f32.mrb[12].mxu0 }
 0x53b   : > { %2814 = vmatprep.subr.bf16.mxu0 %v2813_v19  ;;  %v1433_v36 = vpop.f32.mrb[13].mxu0 }
 0x53c   : > { %2543 = vmatprep.mubr.msk.f32.mxu0 %vm1469_vm1, %v1433_v36 }
 0x53e   : > { %2816 = vmatpush3.bf16.msra.mxu0 %v2813_v19  ;;  %v2482_v30 = vpop.f32.mrb[14].mxu0 }
 0x53f   : > { %2818 = vmatprep.subr.bf16.mxu0 %v2817_v24  ;;  %v1443_v31 = vpop.f32.mrb[15].mxu0 }
 0x542   : > { %2820 = vmatpush3.bf16.msra.mxu0 %v2817_v24 }
 0x545   : > { %2544 = vmatmul.mubr.msk.f32.vlgmr.msra.gmra.mrb[16].mxu0 %vm1469_vm1, %v2479_v23 }
 0x546   : > { %2546 = vmatprep.mubr.msk.f32.mxu0 %vm1469_vm1, %v1443_v31 }
 0x549   : > { %2547 = vmatmul.mubr.msk.f32.gmra.mrb[18].mxu0 %vm1469_vm1, %v2482_v30 }
 0x618   : > { %v2545_v33 = vpop.f32.mrb[16].mxu0 }
 0x619   : > { %v1782_v34 = vadd.f32 %v2545_v33, %v2003_v32  ;;  %v1751_v37 = vpop.f32.mrb[17].mxu0 }
 0x61a   : > { %v1781_v38 = vadd.f32 %v2003_v32, %v1751_v37 }
 0x61b   : > { %v1786_v39 = vadd.f32 %v1782_v34, %v3406_v25 }
 0x61c   : > { %v1785_v40 = vadd.f32 %v1781_v38, %v3402_v9  ;;  %v2548_v41 = vpop.f32.mrb[18].mxu0 }
 0x61d   : > { %1790 = vst [vmem:[%s421_s19 + $0x8] sm:$0xff] %v1786_v39  ;;  %v1784_v43 = vadd.f32 %v2548_v41, %v2003_v32  ;;  %v1761_v44 = vpop.f32.mrb[19].mxu0 }
 0x61e   : > { %1789 = vst [vmem:[%s421_s19] sm:$0xff] %v1785_v40  ;;  %v1783_v46 = vadd.f32 %v2003_v32, %v1761_v44 }
 0x61f   : > { %v1788_v25 = vadd.f32 %v1784_v43, %v3414_v27 }
 0x620   : > { %v1787_v9 = vadd.f32 %v1783_v46, %v3409_v26 }
 0x621   : > { %1792 = vst [vmem:[%s421_s19 + $0x18] sm:$0xff] %v1788_v25 }
 0x622   : > { %1791 = vst [vmem:[%s421_s19 + $0x10] sm:$0xff] %v1787_v9 }
 0x623   : > { %3049 = shalt.err (!%p3046_p4)
}
 0x624   : > { %s3050_s27 = scalar_lea.hbm %s3760_s26, 512  ;;  %s3054_s19 = scalar_lea.hbm %s3841_s29, 1024 }
 0x625   : > { %p3051_p9 = scmp.ne.s32.totalorder %s3760_s26, %s3050_s27  ;;  %p3055_p8 = scmp.lt.u32.totalorder %s3760_s26, %s3841_s29 }
 0x626   : > { %p3056_p13 = scmp.lt.u32.totalorder %s3054_s19, %s3050_s27  ;;  %p3058_p10 = scmp.lt.u32.totalorder %s3050_s27, %s3760_s26 }
 0x627   : > { %p3052_p0 = pnand %p3051_p9, %p3330_p5 }
 0x628   : > { %p3057_p6 = por %p3056_p13, %p3055_p8 }
 0x629   : > { %p3053_p11 = pneg %p3052_p0 }
 0x62a   : > { %p3059_p3 = por %p3058_p10, %p3057_p6 }
 0x62c   : > { %p3060_p7 = pnand %p3059_p3, %p3053_p11 }
 0x62e   : > { %3063 = shalt.err (!%p3060_p7)
}
 0x62f   : > { %s3119_s11 = smov 128   ;;  %s3120_s24 = smov 8  }
 0x630   : > { %2855 = dma.vmem_to_hbm [thread:$0]  (%p3330_p5), %s3754_s21, 512, %s3760_s26, %s1794_s17, %s3119_s11, %s3119_s11, %s3120_s24  }
 0x631 PF: > { %s3842_s12 = sld [smem:[#allocation15_spill]]  ;;  %s3843_s18 = sld [smem:[#allocation16_spill]] }
 0x632   : > { %p3845_p1 = scmp.ge.s32.totalorder %s3110_s16, 2 }
 0x637   : > { %s1822_s28 = sand.u32 1, %s3842_s12   ;;  %p3844_p12 = scmp.ne.s32.totalorder %s3843_s18, 0 }
 0x638   : > { %s1823_s27 = scalar_lea.sflag [#allocation4], %s1822_s28 }
 0x639   : > { %p2872_p2 = pnand %p3845_p1, %p3844_p12 }
 0x63b   : > { %3093 = dma.done.wait (!%p2872_p2), %s1823_s27, 512  }
 0x63c   : > { %3095 = vsyncadd (!%p2872_p2), %s1823_s27, 4294966784  ;;  %s3846_s23 = smov %s3326_s13  ;;  %p25_p4 = scmp.ge.s32.totalorder %s3316_s22, 4  }
 0x63d   : > { %s3847_s13 = smov %s3102_s14  ;;  %s3848_s14 = smov %s3106_s15 }
 0x63e   : > { %s3849_s15 = smov %s3846_s23  ;;  %s3850_s16 = smov %s3316_s22 }
 0x63f   :  { %27 = sbr.rel (!%p25_p4) target bundleno = 10 (0xa), region = 123 }
 0x646   :  { %1828 = vsyncpa [#allocation3], 1 }
 0x647   :  { %1830 = vsyncpa [#allocation3 + $0x1], 1 }
 0x648   :  { %1831 = vsyncpa [#allocation6], 1 }
 0x649   :  { %1832 = vsyncpa [#allocation9], 1 }
 0x64a   :  { %1833 = vsyncpa [#allocation4], 1 }
 0x64b   :  { %1835 = vsyncpa [#allocation4 + $0x1], 1 }

</bundles_post_ra>
